<compile_context>
chip_gen: v7x
topology: tpu7x:2x2x1
jax: 0.10.0
libtpu: 0.0.40
codegen_flags: <defaults>
</compile_context>

<pallas_src>
import jax
import jax.numpy as jnp
from jax.experimental import pallas as pl
from jax.experimental.pallas import tpu as pltpu

EPS = 1e-4    # ProtGNN prototype epsilon
LANE = 128    # TPU lane width


def _protgnn_kernel(x_ref, a_ref, r_ref,
                    w1_ref, b1_ref, w2_ref, b2_ref, w3_ref, b3_ref,
                    proto_ref, wl_ref,
                    emb1_ref, slab_ref):
    H = w1_ref.shape[1]
    P = proto_ref.shape[0]
    C = wl_ref.shape[1]
    L = slab_ref.shape[2] // 4

    x = x_ref[0]          # [GN, F]   bf16 node features (G graphs stacked)
    a_blk = a_ref[0]      # [GN, GN]  bf16 block-diagonal normalized adjacency
    r = r_ref[0]          # [G, GN]   f32 masked-mean readout matrix

    def gcn(h_bf16, w_ref, b_ref):
        # ReLU(A_blk @ (H @ W) + b), bf16 MXU matmuls with f32 accumulation.
        hw = jnp.dot(h_bf16, w_ref[...], preferred_element_type=jnp.float32)
        h = jnp.dot(a_blk, hw.astype(jnp.bfloat16),
                    preferred_element_type=jnp.float32)
        return jnp.maximum(h + b_ref[...], 0.0)

    h = gcn(x, w1_ref, b1_ref)                                   # [GN, H]
    h = gcn(h.astype(jnp.bfloat16), w2_ref, b2_ref)
    h = gcn(h.astype(jnp.bfloat16), w3_ref, b3_ref)              # emb1 (f32)

    emb1_ref[0] = h.astype(emb1_ref.dtype)

    # --- masked global-mean readout as one small (f32) matmul
    g_emb = jnp.dot(r, h, preferred_element_type=jnp.float32)    # [G, H]

    # --- prototype layer: direct f32 squared distances (no cancellation)
    protos = proto_ref[...]                                      # [P, H]
    diff = g_emb[:, None, :] - protos[None, :, :]                # [G, P, H]
    dist = jnp.sum(diff * diff, axis=-1)                         # [G, P]

    # --- prototype activation + linear classifier
    sim = jnp.log((dist + 1.0) / (dist + EPS))                   # [G, P]
    logits = jnp.dot(sim, wl_ref[...],
                     preferred_element_type=jnp.float32)         # [G, C]

    # --- softmax (exact reciprocal so rows sum to 1)
    m = jnp.max(logits, axis=-1, keepdims=True)
    e = jnp.exp(logits - m)
    prob = e / jnp.sum(e, axis=-1, keepdims=True)

    # --- pack the small per-graph outputs into one lane-dense [G, 4*L] slab
    #     (cols [0,L): emb2, [L,2L): min_dist, [2L,3L): logits, [3L,4L): prob)
    slab_ref[...] = jnp.zeros_like(slab_ref)
    slab_ref[0, :, 0:H] = g_emb
    slab_ref[0, :, L:L + P] = dist
    slab_ref[0, :, 2 * L:2 * L + C] = logits
    slab_ref[0, :, 3 * L:3 * L + C] = prob
    # TODO(synk): fold the four partial stores into a single unmasked store
    # once unaligned lane-concat support is confirmed on the target Mosaic.


def _choose_graphs_per_block(B, N, target_rows=256):
    """Fold graphs so each grid step feeds ~256 MXU rows (v6e/v7x-wide MXU),
    keeping >= 2 (preferably an even number of) grid steps so the 'parallel'
    axis splits across TensorCores (v7x megacore)."""
    if B <= 1 or N >= target_rows:
        return 1
    G = max(1, min(B, target_rows // N))
    while G > 1 and pl.cdiv(B, G) < 2:
        G = max(1, G // 2)
    nb = pl.cdiv(B, G)
    if G > 1 and nb > 1 and nb % 2 == 1:
        for g in range(G, max(G // 2, 1) - 1, -1):
            if pl.cdiv(B, g) % 2 == 0:
                G = g
                break
    return G


def _vmem_capacity_bytes():
    try:
        cap = getattr(pltpu.get_tpu_info(), "vmem_capacity_bytes", None)
        if cap:
            return int(cap)
    except Exception:
        pass
    return 128 << 20   # v5e/v6e physical VMEM; v7x reports its own 64 MiB


def protgnn_forward(x, adj, params, node_mask=None, graphs_per_block=None,
                    emb1_dtype=jnp.bfloat16):
    """x: [B, N, F], adj: [B, N, N] (normalized, dense), node_mask: [B, N]."""
    B, N, F = x.shape
    H = params["w1"].shape[1]
    P = params["protos"].shape[0]
    C = params["w_last"].shape[1]

    if node_mask is None:
        node_mask = jnp.ones((B, N), jnp.float32)
    mask = node_mask.astype(jnp.float32)

    G = graphs_per_block or _choose_graphs_per_block(B, N)
    num_blocks = pl.cdiv(B, G)
    B_pad = num_blocks * G
    if B_pad != B:
        pad = B_pad - B
        x = jnp.pad(x, ((0, pad), (0, 0), (0, 0)))
        adj = jnp.pad(adj, ((0, pad), (0, 0), (0, 0)))
        mask = jnp.pad(mask, ((0, pad), (0, 0)))

    GN = G * N
    L = LANE * pl.cdiv(max(H, P, C), LANE)

    # ---- wrapper-side prep (plain XLA, outside the kernel) -----------------
    x_blk = x.astype(jnp.float32).reshape(num_blocks, GN, F).astype(jnp.bfloat16)

    eye_g = jnp.eye(G, dtype=jnp.float32)
    adj_b = adj.astype(jnp.float32).reshape(num_blocks, G, N, N)
    # block-diagonal adjacency per block: one big MXU matmul instead of G tiny ones
    a_blk = (adj_b[:, :, :, None, :] * eye_g[None, :, None, :, None]
             ).reshape(num_blocks, GN, GN).astype(jnp.bfloat16)

    mask_b = mask.reshape(num_blocks, G, N)
    cnt = jnp.maximum(jnp.sum(mask_b, axis=-1, keepdims=True), 1.0)
    w_read = mask_b / cnt                                         # [nb, G, N]
    r_blk = (w_read[:, :, None, :] * eye_g[None, :, :, None]
             ).reshape(num_blocks, G, GN)                         # [nb, G, GN]

    w1 = params["w1"].astype(jnp.bfloat16)
    w2 = params["w2"].astype(jnp.bfloat16)
    w3 = params["w3"].astype(jnp.bfloat16)
    b1 = params["b1"].astype(jnp.float32).reshape(1, H)
    b2 = params["b2"].astype(jnp.float32).reshape(1, H)
    b3 = params["b3"].astype(jnp.float32).reshape(1, H)
    protos = params["protos"].astype(jnp.float32)
    wl = params["w_last"].astype(jnp.float32)

    per_block = lambda i: (i, 0, 0)
    shared = lambda i: (0, 0)
    single = pl.Buffered(1)   # constant index_map -> no double buffering

    in_specs = [
        pl.BlockSpec((1, GN, F), per_block),        # node features
        # TODO(synk): for G==1 / very large N (v7x 64 MiB VMEM), row-tile the
        # adjacency via a second grid axis instead of one [N, N] block.
        pl.BlockSpec((1, GN, GN), per_block),       # block-diag adjacency
        pl.BlockSpec((1, G, GN), per_block),        # readout matrix
        pl.BlockSpec((F, H), shared, pipeline_mode=single),   # w1 (bf16)
        pl.BlockSpec((1, H), shared, pipeline_mode=single),   # b1
        pl.BlockSpec((H, H), shared, pipeline_mode=single),   # w2 (bf16)
        pl.BlockSpec((1, H), shared, pipeline_mode=single),   # b2
        pl.BlockSpec((H, H), shared, pipeline_mode=single),   # w3 (bf16)
        pl.BlockSpec((1, H), shared, pipeline_mode=single),   # b3
        pl.BlockSpec((P, H), shared, pipeline_mode=single),   # prototypes
        pl.BlockSpec((P, C), shared, pipeline_mode=single),   # last-layer W
    ]
    out_specs = [
        pl.BlockSpec((1, GN, H), per_block),        # emb1 (bf16)
        pl.BlockSpec((1, G, 4 * L), per_block),     # packed small outputs
    ]
    out_shapes = (
        jax.ShapeDtypeStruct((num_blocks, GN, H), emb1_dtype),
        jax.ShapeDtypeStruct((num_blocks, G, 4 * L), jnp.float32),
    )

    # ---- VMEM budget: double-buffered per-block IO + single-buffered weights
    emb1_bytes = jnp.dtype(emb1_dtype).itemsize
    blk_in = GN * F * 2 + GN * GN * 2 + G * GN * 4
    blk_out = GN * H * emb1_bytes + G * 4 * L * 4
    weight_bytes = (F * H + 2 * H * H) * 2 + 3 * H * 4 + P * H * 4 + P * C * 4
    live = (4 * GN * H + G * P * H + GN * GN) * 4        # in-kernel temporaries
    need = 2 * (blk_in + blk_out) + weight_bytes + live
    vmem_limit = int(min(max(32 << 20, 2 * need),
                         0.85 * _vmem_capacity_bytes()))

    flops = num_blocks * (2 * GN * F * H + 2 * 2 * GN * H * H
                          + 3 * 2 * GN * GN * H
                          + 2 * G * GN * H + 3 * G * P * H + 2 * G * P * C)
    cost = pl.CostEstimate(
        flops=flops,
        transcendentals=num_blocks * (G * P + G * C),
        bytes_accessed=num_blocks * (blk_in + blk_out) + weight_bytes)

    emb1_blk, slab = pl.pallas_call(
        _protgnn_kernel,
        out_shape=out_shapes,
        grid_spec=pltpu.PrefetchScalarGridSpec(
            num_scalar_prefetch=0,
            grid=(num_blocks,),
            in_specs=in_specs,
            out_specs=out_specs),
        compiler_params=pltpu.CompilerParams(
            dimension_semantics=("parallel",),
            vmem_limit_bytes=vmem_limit),
        cost_estimate=cost,
    )(x_blk, a_blk, r_blk, w1, b1, w2, b2, w3, b3, protos, wl)

    emb1 = emb1_blk.reshape(B_pad, N, H)[:B]
    slab = slab.reshape(B_pad, 4 * L)[:B]
    emb2 = slab[:, 0:H]
    mind = slab[:, L:L + P]
    logits = slab[:, 2 * L:2 * L + C]
    prob = slab[:, 3 * L:3 * L + C]
    return logits, prob, emb1, emb2, mind


def _reference_forward(x, adj, params, node_mask=None):
    """Pure-JAX f32 reference of the same forward pass."""
    def gcn(h, w, b):
        return jax.nn.relu(jnp.einsum('bmn,bnh->bmh', adj, h @ w) + b)

    h = gcn(x, params["w1"], params["b1"])
    h = gcn(h, params["w2"], params["b2"])
    h = gcn(h, params["w3"], params["b3"])
    emb1 = h
    if node_mask is None:
        emb2 = jnp.mean(h, axis=1)
    else:
        m = node_mask.astype(jnp.float32)[..., None]
        emb2 = jnp.sum(h * m, axis=1) / jnp.maximum(jnp.sum(m, axis=1), 1.0)
    d = jnp.sum((emb2[:, None, :] - params["protos"][None]) ** 2, axis=-1)
    sim = jnp.log((d + 1.0) / (d + EPS))
    logits = sim @ params["w_last"]
    prob = jax.nn.softmax(logits, axis=-1)
    return logits, prob, emb1, emb2, d


def _make_params(key, F, H, P, C):
    ks = jax.random.split(key, 8)
    s = 0.1
    return {
        "w1": s * jax.random.normal(ks[0], (F, H), jnp.float32),
        "b1": 0.05 * jax.random.normal(ks[1], (1, H), jnp.float32),
        "w2": s * jax.random.normal(ks[2], (H, H), jnp.float32),
        "b2": 0.05 * jax.random.normal(ks[3], (1, H), jnp.float32),
        "w3": s * jax.random.normal(ks[4], (H, H), jnp.float32),
        "b3": 0.05 * jax.random.normal(ks[5], (1, H), jnp.float32),
        "protos": jax.random.uniform(ks[6], (P, H), jnp.float32),
        "w_last": s * jax.random.normal(ks[7], (P, C), jnp.float32),
    }


def _make_inputs(key, B, N, F):
    kx, ka = jax.random.split(key)
    x = jax.random.normal(kx, (B, N, F), jnp.float32)
    # random symmetric adjacency with self loops, symmetric normalization
    a = (jax.random.uniform(ka, (B, N, N)) > 0.7).astype(jnp.float32)
    a = jnp.maximum(a, jnp.transpose(a, (0, 2, 1)))
    a = a + jnp.eye(N, dtype=jnp.float32)[None]
    deg = jnp.sum(a, axis=-1)
    dinv = 1.0 / jnp.sqrt(deg)
    adj = a * dinv[:, :, None] * dinv[:, None, :]   # D^-1/2 (A+I) D^-1/2
    return x, adj


if __name__ == "__main__":
    B, N, F, H, P, C = 4, 16, 8, 32, 8, 2
    key = jax.random.PRNGKey(0)
    kin, kpar = jax.random.split(key)
    x, adj = _make_inputs(kin, B, N, F)
    params = _make_params(kpar, F, H, P, C)

    # ---- full-mask run ------------------------------------------------------
    logits, prob, emb1, emb2, mind = protgnn_forward(x, adj, params)
    jax.block_until_ready((logits, prob, emb1, emb2, mind))

    assert logits.shape == (B, C) and prob.shape == (B, C)
    assert emb1.shape == (B, N, H) and emb2.shape == (B, H) and mind.shape == (B, P)
    for a in (logits, prob, emb1, emb2, mind):
        assert bool(jnp.all(jnp.isfinite(a.astype(jnp.float32))))
    assert bool(jnp.all(jnp.abs(jnp.sum(prob, axis=-1) - 1.0) < 1e-4))

    r_logits, r_prob, r_emb1, r_emb2, r_mind = _reference_forward(x, adj, params)
    assert float(jnp.max(jnp.abs(emb1.astype(jnp.float32) - r_emb1))) < 0.05
    assert float(jnp.max(jnp.abs(emb2 - r_emb2))) < 0.05
    assert float(jnp.max(jnp.abs(mind - r_mind))) < 0.2
    assert float(jnp.max(jnp.abs(logits - r_logits))) < 0.05
    assert float(jnp.max(jnp.abs(prob - r_prob))) < 0.05

    # ---- masked (ragged node count) run -------------------------------------
    lengths = jnp.array([16, 12, 8, 5], jnp.int32)
    nmask = (jnp.arange(N)[None, :] < lengths[:, None]).astype(jnp.float32)
    x_m = x * nmask[..., None]
    adj_m = adj * nmask[:, :, None] * nmask[:, None, :]

    m_logits, m_prob, _, m_emb2, m_mind = protgnn_forward(
        x_m, adj_m, params, node_mask=nmask)
    jax.block_until_ready((m_logits, m_prob, m_emb2, m_mind))
    s_logits, s_prob, _, s_emb2, s_mind = _reference_forward(
        x_m, adj_m, params, node_mask=nmask)
    assert float(jnp.max(jnp.abs(m_emb2 - s_emb2))) < 0.05
    assert float(jnp.max(jnp.abs(m_mind - s_mind))) < 0.2
    assert float(jnp.max(jnp.abs(m_logits - s_logits))) < 0.05
    assert float(jnp.max(jnp.abs(m_prob - s_prob))) < 0.05

    print("KERNEL_OK")
</pallas_src>

<mosaic_0001>
module attributes {stable_mosaic.version = 11 : i64} {
  func.func @_protgnn_kernel(%arg0: i32, %arg1: memref<1x32x8xbf16, #tpu.memory_space<vmem>>, %arg2: memref<1x32x32xbf16, #tpu.memory_space<vmem>>, %arg3: memref<1x2x32xf32, #tpu.memory_space<vmem>>, %arg4: memref<8x32xbf16, #tpu.memory_space<vmem>>, %arg5: memref<1x32xf32, #tpu.memory_space<vmem>>, %arg6: memref<32x32xbf16, #tpu.memory_space<vmem>>, %arg7: memref<1x32xf32, #tpu.memory_space<vmem>>, %arg8: memref<32x32xbf16, #tpu.memory_space<vmem>>, %arg9: memref<1x32xf32, #tpu.memory_space<vmem>>, %arg10: memref<8x32xf32, #tpu.memory_space<vmem>>, %arg11: memref<8x2xf32, #tpu.memory_space<vmem>>, %arg12: memref<1x32x32xbf16, #tpu.memory_space<vmem>>, %arg13: memref<1x2x512xf32, #tpu.memory_space<vmem>>) attributes {dimension_semantics = [#tpu.dimension_semantics<parallel>], iteration_bounds = array<i64: 2>, scalar_prefetch = 0 : i64, scratch_operands = 0 : i64, tpu.core_type = #tpu.core_type<tc>, window_params = [{transform_indices = @transform_0, window_bounds = array<i64: 1, 32, 8>}, {transform_indices = @transform_1, window_bounds = array<i64: 1, 32, 32>}, {transform_indices = @transform_2, window_bounds = array<i64: 1, 2, 32>}, {pipeline_mode = #tpu.pipeline_mode<synchronous>, transform_indices = @transform_3, window_bounds = array<i64: 8, 32>}, {pipeline_mode = #tpu.pipeline_mode<synchronous>, transform_indices = @transform_4, window_bounds = array<i64: 1, 32>}, {pipeline_mode = #tpu.pipeline_mode<synchronous>, transform_indices = @transform_5, window_bounds = array<i64: 32, 32>}, {pipeline_mode = #tpu.pipeline_mode<synchronous>, transform_indices = @transform_6, window_bounds = array<i64: 1, 32>}, {pipeline_mode = #tpu.pipeline_mode<synchronous>, transform_indices = @transform_7, window_bounds = array<i64: 32, 32>}, {pipeline_mode = #tpu.pipeline_mode<synchronous>, transform_indices = @transform_8, window_bounds = array<i64: 1, 32>}, {pipeline_mode = #tpu.pipeline_mode<synchronous>, transform_indices = @transform_9, window_bounds = array<i64: 8, 32>}, {pipeline_mode = #tpu.pipeline_mode<synchronous>, transform_indices = @transform_10, window_bounds = array<i64: 8, 2>}, {transform_indices = @transform_11, window_bounds = array<i64: 1, 32, 32>}, {transform_indices = @transform_12, window_bounds = array<i64: 1, 2, 512>}]} {
    %c0 = arith.constant 0 : index
    %c0_0 = arith.constant 0 : index
    %c0_1 = arith.constant 0 : index
    %0 = vector.load %arg1[%c0, %c0_0, %c0_1] : memref<1x32x8xbf16, #tpu.memory_space<vmem>>, vector<1x32x8xbf16>
    %1 = vector.shape_cast %0 : vector<1x32x8xbf16> to vector<32x8xbf16>
    %c0_2 = arith.constant 0 : index
    %c0_3 = arith.constant 0 : index
    %c0_4 = arith.constant 0 : index
    %2 = vector.load %arg2[%c0_2, %c0_3, %c0_4] : memref<1x32x32xbf16, #tpu.memory_space<vmem>>, vector<1x32x32xbf16>
    %3 = vector.shape_cast %2 : vector<1x32x32xbf16> to vector<32x32xbf16>
    %c0_5 = arith.constant 0 : index
    %c0_6 = arith.constant 0 : index
    %c0_7 = arith.constant 0 : index
    %4 = vector.load %arg3[%c0_5, %c0_6, %c0_7] : memref<1x2x32xf32, #tpu.memory_space<vmem>>, vector<1x2x32xf32>
    %5 = vector.shape_cast %4 : vector<1x2x32xf32> to vector<2x32xf32>
    %c0_8 = arith.constant 0 : index
    %c0_9 = arith.constant 0 : index
    %6 = vector.load %arg4[%c0_8, %c0_9] : memref<8x32xbf16, #tpu.memory_space<vmem>>, vector<8x32xbf16>
    %cst = arith.constant dense<0.000000e+00> : vector<32x32xf32>
    %7 = tpu.matmul %1, %6, %cst {dimension_numbers = #tpu.dot_dimension_numbers<[1], [0], [0], [1], [0, 0, 1, 1], [], []>} : vector<32x8xbf16>, vector<8x32xbf16>, vector<32x32xf32> -> vector<32x32xf32>
    %8 = arith.truncf %7 : vector<32x32xf32> to vector<32x32xbf16>
    %cst_10 = arith.constant dense<0.000000e+00> : vector<32x32xf32>
    %9 = tpu.matmul %3, %8, %cst_10 {dimension_numbers = #tpu.dot_dimension_numbers<[1], [0], [0], [1], [0, 0, 1, 1], [], []>} : vector<32x32xbf16>, vector<32x32xbf16>, vector<32x32xf32> -> vector<32x32xf32>
    %c0_11 = arith.constant 0 : index
    %c0_12 = arith.constant 0 : index
    %10 = vector.load %arg5[%c0_11, %c0_12] : memref<1x32xf32, #tpu.memory_space<vmem>>, vector<1x32xf32>
    %11 = vector.broadcast %10 : vector<1x32xf32> to vector<32x32xf32>
    %12 = arith.addf %9, %11 : vector<32x32xf32>
    %cst_13 = arith.constant 0.000000e+00 : f32
    %13 = vector.broadcast %cst_13 : f32 to vector<32x32xf32>
    %14 = arith.maximumf %12, %13 : vector<32x32xf32>
    %15 = arith.truncf %14 : vector<32x32xf32> to vector<32x32xbf16>
    %c0_14 = arith.constant 0 : index
    %c0_15 = arith.constant 0 : index
    %16 = vector.load %arg6[%c0_14, %c0_15] : memref<32x32xbf16, #tpu.memory_space<vmem>>, vector<32x32xbf16>
    %cst_16 = arith.constant dense<0.000000e+00> : vector<32x32xf32>
    %17 = tpu.matmul %15, %16, %cst_16 {dimension_numbers = #tpu.dot_dimension_numbers<[1], [0], [0], [1], [0, 0, 1, 1], [], []>} : vector<32x32xbf16>, vector<32x32xbf16>, vector<32x32xf32> -> vector<32x32xf32>
    %18 = arith.truncf %17 : vector<32x32xf32> to vector<32x32xbf16>
    %cst_17 = arith.constant dense<0.000000e+00> : vector<32x32xf32>
    %19 = tpu.matmul %3, %18, %cst_17 {dimension_numbers = #tpu.dot_dimension_numbers<[1], [0], [0], [1], [0, 0, 1, 1], [], []>} : vector<32x32xbf16>, vector<32x32xbf16>, vector<32x32xf32> -> vector<32x32xf32>
    %c0_18 = arith.constant 0 : index
    %c0_19 = arith.constant 0 : index
    %20 = vector.load %arg7[%c0_18, %c0_19] : memref<1x32xf32, #tpu.memory_space<vmem>>, vector<1x32xf32>
    %21 = vector.broadcast %20 : vector<1x32xf32> to vector<32x32xf32>
    %22 = arith.addf %19, %21 : vector<32x32xf32>
    %cst_20 = arith.constant 0.000000e+00 : f32
    %23 = vector.broadcast %cst_20 : f32 to vector<32x32xf32>
    %24 = arith.maximumf %22, %23 : vector<32x32xf32>
    %25 = arith.truncf %24 : vector<32x32xf32> to vector<32x32xbf16>
    %c0_21 = arith.constant 0 : index
    %c0_22 = arith.constant 0 : index
    %26 = vector.load %arg8[%c0_21, %c0_22] : memref<32x32xbf16, #tpu.memory_space<vmem>>, vector<32x32xbf16>
    %cst_23 = arith.constant dense<0.000000e+00> : vector<32x32xf32>
    %27 = tpu.matmul %25, %26, %cst_23 {dimension_numbers = #tpu.dot_dimension_numbers<[1], [0], [0], [1], [0, 0, 1, 1], [], []>} : vector<32x32xbf16>, vector<32x32xbf16>, vector<32x32xf32> -> vector<32x32xf32>
    %28 = arith.truncf %27 : vector<32x32xf32> to vector<32x32xbf16>
    %cst_24 = arith.constant dense<0.000000e+00> : vector<32x32xf32>
    %29 = tpu.matmul %3, %28, %cst_24 {dimension_numbers = #tpu.dot_dimension_numbers<[1], [0], [0], [1], [0, 0, 1, 1], [], []>} : vector<32x32xbf16>, vector<32x32xbf16>, vector<32x32xf32> -> vector<32x32xf32>
    %c0_25 = arith.constant 0 : index
    %c0_26 = arith.constant 0 : index
    %30 = vector.load %arg9[%c0_25, %c0_26] : memref<1x32xf32, #tpu.memory_space<vmem>>, vector<1x32xf32>
    %31 = vector.broadcast %30 : vector<1x32xf32> to vector<32x32xf32>
    %32 = arith.addf %29, %31 : vector<32x32xf32>
    %cst_27 = arith.constant 0.000000e+00 : f32
    %33 = vector.broadcast %cst_27 : f32 to vector<32x32xf32>
    %34 = arith.maximumf %32, %33 : vector<32x32xf32>
    %35 = arith.truncf %34 : vector<32x32xf32> to vector<32x32xbf16>
    %c0_28 = arith.constant 0 : index
    %c0_29 = arith.constant 0 : index
    %c0_30 = arith.constant 0 : index
    %36 = vector.load %arg12[%c0_28, %c0_29, %c0_30] : memref<1x32x32xbf16, #tpu.memory_space<vmem>>, vector<1x32x32xbf16>
    %37 = vector.shape_cast %36 : vector<1x32x32xbf16> to vector<32x32xbf16>
    %38 = vector.shape_cast %35 : vector<32x32xbf16> to vector<1x32x32xbf16>
    tpu.vector_store %arg12[%c0_28, %c0_29, %c0_30], %38 {strides = array<i32>} : memref<1x32x32xbf16, #tpu.memory_space<vmem>>, vector<1x32x32xbf16>,
    %cst_31 = arith.constant dense<0.000000e+00> : vector<2x32xf32>
    %39 = tpu.matmul %5, %34, %cst_31 {dimension_numbers = #tpu.dot_dimension_numbers<[1], [0], [0], [1], [0, 0, 1, 1], [], []>} : vector<2x32xf32>, vector<32x32xf32>, vector<2x32xf32> -> vector<2x32xf32>
    %c0_32 = arith.constant 0 : index
    %c0_33 = arith.constant 0 : index
    %40 = vector.load %arg10[%c0_32, %c0_33] : memref<8x32xf32, #tpu.memory_space<vmem>>, vector<8x32xf32>
    %41 = vector.shape_cast %39 : vector<2x32xf32> to vector<2x1x32xf32>
    %42 = vector.shape_cast %40 : vector<8x32xf32> to vector<1x8x32xf32>
    %43 = vector.broadcast %41 : vector<2x1x32xf32> to vector<2x8x32xf32>
    %44 = vector.broadcast %42 : vector<1x8x32xf32> to vector<2x8x32xf32>
    %45 = arith.subf %43, %44 : vector<2x8x32xf32>
    %46 = arith.mulf %45, %45 : vector<2x8x32xf32>
    %cst_34 = arith.constant dense<0.000000e+00> : vector<2x8xf32>
    %47 = vector.multi_reduction <add>, %46, %cst_34 [2] : vector<2x8x32xf32> to vector<2x8xf32>
    %cst_35 = arith.constant 1.000000e+00 : f32
    %48 = vector.broadcast %cst_35 : f32 to vector<2x8xf32>
    %49 = arith.addf %47, %48 : vector<2x8xf32>
    %cst_36 = arith.constant 9.99999974E-5 : f32
    %50 = vector.broadcast %cst_36 : f32 to vector<2x8xf32>
    %51 = arith.addf %47, %50 : vector<2x8xf32>
    %52 = arith.divf %49, %51 : vector<2x8xf32>
    %53 = math.log %52 : vector<2x8xf32>
    %c0_37 = arith.constant 0 : index
    %c0_38 = arith.constant 0 : index
    %54 = vector.load %arg11[%c0_37, %c0_38] : memref<8x2xf32, #tpu.memory_space<vmem>>, vector<8x2xf32>
    %cst_39 = arith.constant dense<0.000000e+00> : vector<2x2xf32>
    %55 = tpu.matmul %53, %54, %cst_39 {dimension_numbers = #tpu.dot_dimension_numbers<[1], [0], [0], [1], [0, 0, 1, 1], [], []>} : vector<2x8xf32>, vector<8x2xf32>, vector<2x2xf32> -> vector<2x2xf32>
    %cst_40 = arith.constant dense<0xFF800000> : vector<2xf32>
    %56 = vector.multi_reduction <maximumf>, %55, %cst_40 [1] : vector<2x2xf32> to vector<2xf32>
    %57 = vector.shape_cast %56 : vector<2xf32> to vector<2x1xf32>
    %58 = vector.broadcast %57 : vector<2x1xf32> to vector<2x2xf32>
    %59 = arith.subf %55, %58 : vector<2x2xf32>
    %60 = math.exp %59 : vector<2x2xf32>
    %cst_41 = arith.constant dense<0.000000e+00> : vector<2xf32>
    %61 = vector.multi_reduction <add>, %60, %cst_41 [1] : vector<2x2xf32> to vector<2xf32>
    %62 = vector.shape_cast %61 : vector<2xf32> to vector<2x1xf32>
    %63 = vector.broadcast %62 : vector<2x1xf32> to vector<2x2xf32>
    %64 = arith.divf %60, %63 : vector<2x2xf32>
    %cst_42 = arith.constant 0.000000e+00 : f32
    %65 = vector.broadcast %cst_42 : f32 to vector<1x2x512xf32>
    %c0_43 = arith.constant 0 : index
    %c0_44 = arith.constant 0 : index
    %c0_45 = arith.constant 0 : index
    %66 = vector.load %arg13[%c0_43, %c0_44, %c0_45] : memref<1x2x512xf32, #tpu.memory_space<vmem>>, vector<1x2x512xf32>
    tpu.vector_store %arg13[%c0_43, %c0_44, %c0_45], %65 {strides = array<i32>} : memref<1x2x512xf32, #tpu.memory_space<vmem>>, vector<1x2x512xf32>,
    %c0_46 = arith.constant 0 : index
    %c0_47 = arith.constant 0 : index
    %c0_48 = arith.constant 0 : index
    %67 = vector.load %arg13[%c0_46, %c0_47, %c0_48] : memref<1x2x512xf32, #tpu.memory_space<vmem>>, vector<1x2x32xf32>
    %68 = vector.shape_cast %67 : vector<1x2x32xf32> to vector<2x32xf32>
    %69 = vector.shape_cast %39 : vector<2x32xf32> to vector<1x2x32xf32>
    tpu.vector_store %arg13[%c0_46, %c0_47, %c0_48], %69 {strides = array<i32>} : memref<1x2x512xf32, #tpu.memory_space<vmem>>, vector<1x2x32xf32>,
    %c0_49 = arith.constant 0 : index
    %c0_50 = arith.constant 0 : index
    %c128 = arith.constant 128 : index
    %70 = vector.load %arg13[%c0_49, %c0_50, %c128] : memref<1x2x512xf32, #tpu.memory_space<vmem>>, vector<1x2x8xf32>
    %71 = vector.shape_cast %70 : vector<1x2x8xf32> to vector<2x8xf32>
    %72 = vector.shape_cast %47 : vector<2x8xf32> to vector<1x2x8xf32>
    tpu.vector_store %arg13[%c0_49, %c0_50, %c128], %72 {strides = array<i32>} : memref<1x2x512xf32, #tpu.memory_space<vmem>>, vector<1x2x8xf32>,
    %c0_51 = arith.constant 0 : index
    %c0_52 = arith.constant 0 : index
    %c256 = arith.constant 256 : index
    %73 = vector.load %arg13[%c0_51, %c0_52, %c256] : memref<1x2x512xf32, #tpu.memory_space<vmem>>, vector<1x2x2xf32>
    %74 = vector.shape_cast %73 : vector<1x2x2xf32> to vector<2x2xf32>
    %75 = vector.shape_cast %55 : vector<2x2xf32> to vector<1x2x2xf32>
    tpu.vector_store %arg13[%c0_51, %c0_52, %c256], %75 {strides = array<i32>} : memref<1x2x512xf32, #tpu.memory_space<vmem>>, vector<1x2x2xf32>,
    %c0_53 = arith.constant 0 : index
    %c0_54 = arith.constant 0 : index
    %c384 = arith.constant 384 : index
    %76 = vector.load %arg13[%c0_53, %c0_54, %c384] : memref<1x2x512xf32, #tpu.memory_space<vmem>>, vector<1x2x2xf32>
    %77 = vector.shape_cast %76 : vector<1x2x2xf32> to vector<2x2xf32>
    %78 = vector.shape_cast %64 : vector<2x2xf32> to vector<1x2x2xf32>
    tpu.vector_store %arg13[%c0_53, %c0_54, %c384], %78 {strides = array<i32>} : memref<1x2x512xf32, #tpu.memory_space<vmem>>, vector<1x2x2xf32>,
    return
  }
  func.func @transform_0(%arg0: i32) -> (i32, i32, i32) {
    %c0_i32 = arith.constant 0 : i32
    %c0_i32_0 = arith.constant 0 : i32
    %c0_i32_1 = arith.constant 0 : i32
    return %arg0, %c0_i32, %c0_i32_0 : i32, i32, i32
  }
  func.func @transform_1(%arg0: i32) -> (i32, i32, i32) {
    %c0_i32 = arith.constant 0 : i32
    %c0_i32_0 = arith.constant 0 : i32
    %c0_i32_1 = arith.constant 0 : i32
    return %arg0, %c0_i32, %c0_i32_0 : i32, i32, i32
  }
  func.func @transform_2(%arg0: i32) -> (i32, i32, i32) {
    %c0_i32 = arith.constant 0 : i32
    %c0_i32_0 = arith.constant 0 : i32
    %c0_i32_1 = arith.constant 0 : i32
    return %arg0, %c0_i32, %c0_i32_0 : i32, i32, i32
  }
  func.func @transform_3(%arg0: i32) -> (i32, i32) {
    %c0_i32 = arith.constant 0 : i32
    %c0_i32_0 = arith.constant 0 : i32
    %c0_i32_1 = arith.constant 0 : i32
    return %c0_i32, %c0_i32_0 : i32, i32
  }
  func.func @transform_4(%arg0: i32) -> (i32, i32) {
    %c0_i32 = arith.constant 0 : i32
    %c0_i32_0 = arith.constant 0 : i32
    %c0_i32_1 = arith.constant 0 : i32
    return %c0_i32, %c0_i32_0 : i32, i32
  }
  func.func @transform_5(%arg0: i32) -> (i32, i32) {
    %c0_i32 = arith.constant 0 : i32
    %c0_i32_0 = arith.constant 0 : i32
    %c0_i32_1 = arith.constant 0 : i32
    return %c0_i32, %c0_i32_0 : i32, i32
  }
  func.func @transform_6(%arg0: i32) -> (i32, i32) {
    %c0_i32 = arith.constant 0 : i32
    %c0_i32_0 = arith.constant 0 : i32
    %c0_i32_1 = arith.constant 0 : i32
    return %c0_i32, %c0_i32_0 : i32, i32
  }
  func.func @transform_7(%arg0: i32) -> (i32, i32) {
    %c0_i32 = arith.constant 0 : i32
    %c0_i32_0 = arith.constant 0 : i32
    %c0_i32_1 = arith.constant 0 : i32
    return %c0_i32, %c0_i32_0 : i32, i32
  }
  func.func @transform_8(%arg0: i32) -> (i32, i32) {
    %c0_i32 = arith.constant 0 : i32
    %c0_i32_0 = arith.constant 0 : i32
    %c0_i32_1 = arith.constant 0 : i32
    return %c0_i32, %c0_i32_0 : i32, i32
  }
  func.func @transform_9(%arg0: i32) -> (i32, i32) {
    %c0_i32 = arith.constant 0 : i32
    %c0_i32_0 = arith.constant 0 : i32
    %c0_i32_1 = arith.constant 0 : i32
    return %c0_i32, %c0_i32_0 : i32, i32
  }
  func.func @transform_10(%arg0: i32) -> (i32, i32) {
    %c0_i32 = arith.constant 0 : i32
    %c0_i32_0 = arith.constant 0 : i32
    %c0_i32_1 = arith.constant 0 : i32
    return %c0_i32, %c0_i32_0 : i32, i32
  }
  func.func @transform_11(%arg0: i32) -> (i32, i32, i32) {
    %c0_i32 = arith.constant 0 : i32
    %c0_i32_0 = arith.constant 0 : i32
    %c0_i32_1 = arith.constant 0 : i32
    return %arg0, %c0_i32, %c0_i32_0 : i32, i32, i32
  }
  func.func @transform_12(%arg0: i32) -> (i32, i32, i32) {
    %c0_i32 = arith.constant 0 : i32
    %c0_i32_0 = arith.constant 0 : i32
    %c0_i32_1 = arith.constant 0 : i32
    return %arg0, %c0_i32, %c0_i32_0 : i32, i32, i32
  }
}

</mosaic_0001>

<bundles_post_ra>
// kernel: tpu_custom_call.1
= control target key start
LH: loop header
LB: loop body
LE: loop exit
PB: predicated region body
PF: predicated region fallthrough
CT: control target
= control target key end

     0   :  { %s2482_s0 = inlined_call_operand.vmem [shape: bf16[2,32,8], index: 0, kind: input, shape index: {}]   ;;  %s2483_s1 = inlined_call_operand.vmem [shape: bf16[2,32,32], index: 1, kind: input, shape index: {}]   ;;  %s2484_s2 = inlined_call_operand.hbm [shape: f32[2,2,32], index: 2, kind: input, shape index: {}]   ;;  %s2485_s3 = inlined_call_operand.hbm [shape: bf16[8,32], index: 3, kind: input, shape index: {}]   ;;  %s2486_s4 = inlined_call_operand.hbm [shape: f32[1,32], index: 4, kind: input, shape index: {}]   ;;  %s2487_s5 = inlined_call_operand.vmem [shape: bf16[32,32], index: 5, kind: input, shape index: {}]   ;;  %s2488_s6 = inlined_call_operand.hbm [shape: f32[1,32], index: 6, kind: input, shape index: {}]   ;;  %s2489_s7 = inlined_call_operand.vmem [shape: bf16[32,32], index: 7, kind: input, shape index: {}]   ;;  %s2490_s8 = inlined_call_operand.vmem [shape: f32[1,32], index: 8, kind: input, shape index: {}]   ;;  %s2491_s9 = inlined_call_operand.vmem [shape: f32[8,32], index: 9, kind: input, shape index: {}]   ;;  %s2492_s10 = inlined_call_operand.vmem [shape: f32[8,2], index: 10, kind: input, shape index: {}]   ;;  %s2493_s11 = inlined_call_operand.hbm [shape: bf16[2,32,32], index: 11, kind: output, shape index: {0}]   ;;  %s2494_s12 = inlined_call_operand.hbm [shape: f32[2,2,512], index: 12, kind: output, shape index: {1}]  }
   0x1   :  { %2502 = sst [smem:[#allocation20_spill]] %s2493_s11 }
   0x2   :  { %2503 = sst [smem:[#allocation21_spill]] %s2494_s12 }
   0x3   :  { %18 = vsyncpa [#allocation3], 0 }
   0x4   :  { %20 = vsyncpa [#allocation3 + $0x1], 0 }
   0x5   :  { %21 = vsyncpa [#allocation6], 0 }
   0x6   :  { %22 = vsyncpa [#allocation9], 0 }
   0x7   :  { %23 = vsyncpa [#allocation4], 0 }
   0x8   :  { %25 = vsyncpa [#allocation4 + $0x1], 0 }
   0x9   :  { %26 = vsyncpa [#allocation12], 0 }
   0xa   :  { %28 = vsyncpa [#allocation12 + $0x1], 0  ;;  %s2094_s21 = smov 0   ;;  %s2096_s22 = smov 0  }
   0xb   :  { %s2098_s23 = smov 0   ;;  %s2100_s24 = smov 0  }
   0xc LB: > { %2504 = sst [smem:[#allocation18_spill]] %s1997_s21  ;;  %s2115_s25 = sadd.s32 4294967295, %s2009_s24   ;;  %s2009_s24 = sphi %s2100_s24, %s2531_s24   ;;  %s2005_s23 = sphi %s2098_s23, %s2530_s23   ;;  %s2001_s22 = sphi %s2096_s22, %s2529_s22   ;;  %s1997_s21 = sphi %s2094_s21, %s2528_s21  }
   0xd   : > { %s1510_s26 = sadd.s32 4294967294, %s2009_s24   ;;  %p106_p0 = scmp.ne.s32.totalorder %s2001_s22, %s1997_s21 }
   0xe   : > { %p2497_p1 = scmp.eq.s32.totalorder %s2115_s25, 0  ;;  %p304_p3 = scmp.eq.s32.totalorder %s1510_s26, 1 }
   0xf   : > { %p1511_p5 = scmp.ge.s32.totalorder %s2009_s24, 1  ;;  %p337_p7 = scmp.lt.s32.totalorder %s2009_s24, 3 }
  0x10   : > { %p2124_p4 = por %p2497_p1, %p106_p0  ;;  %p2129_p6 = por %p304_p3, %p106_p0 }
  0x11   : > { %p2134_p8 = pnand %p1511_p5, %p337_p7  ;;  %s2011_s30 = smov [#allocation5]  }
  0x12   : > { %s2505_s27 = scalar_select %p2124_p4, 1, 0 }
  0x13   : > { %s2506_s28 = scalar_select %p2129_p6, 1, 0 }
  0x14   : > { %s2508_s29 = scalar_select %p2134_p8, 1, 0 }
  0x15   : > { %2507 = sst [smem:[#allocation19_spill]] %s2506_s28  ;;  %s350_s13 = sshll.u32 %s2011_s30, 4  ;;  %s351_s13 = int_to_ptr.vmem [resolvable:$true] %s350_s13 }
  0x16   : > { %p1691_p10 = pneg %p2134_p8  ;;  %s2012_s14 = smov [#allocation7]  }
  0x17   : > { %s361_s15 = sshll.u32 %s2012_s14, 4  ;;  %s2013_s17 = smov [#allocation8]   ;;  %s2147_s15 = int_to_ptr.vmem [resolvable:$true] %s361_s15 }
  0x18   : > { %p2143_p11 = pnand %p1691_p10, %p2497_p1  ;;  %s375_s18 = sshll.u32 %s2013_s17, 4  ;;  %s2149_s18 = int_to_ptr.vmem [resolvable:$true] %s375_s18 }
  0x19   : > { %s1789_s26 = scalar_lea.hbm %s2485_s3, 64 }
  0x1a   : > { %p1790_p12 = scmp.ne.s32.totalorder %s2485_s3, %s1789_s26  ;;  %p2159_p13 = pneg %p2143_p11 }
  0x1b   : > { %p1796_p5 = scmp.lt.u32.totalorder %s1789_s26, %s2485_s3 }
  0x1c   : > { %p1792_p0 = pnand %p2159_p13, %p1790_p12 }
  0x1e   : > { %p1793_p3 = pneg %p1792_p0 }
  0x20   : > { %p1798_p7 = pnand %p1796_p5, %p1793_p3 }
  0x22   : > { %1801 = shalt.err (!%p1798_p7)
}
  0x23   : > { %s1802_s19 = scalar_lea.vmem %s351_s13, 64  ;;  %p1810_p2 = scmp.lt.s32.totalorder %s351_s13, %s351_s13 }
  0x24   : > { %p1803_p10 = scmp.ne.s32.totalorder %s351_s13, %s1802_s19  ;;  %p1811_p6 = scmp.lt.s32.totalorder %s1802_s19, %s1802_s19 }
  0x26   : > { %p1805_p9 = pnand %p1803_p10, %p2159_p13  ;;  %p1812_p4 = por %p1811_p6, %p1810_p2 }
  0x28   : > { %p1806_p1 = pneg %p1805_p9 }
  0x2a   : > { %p1813_p8 = pnand %p1812_p4, %p1806_p1 }
  0x2c   : > { %1816 = shalt.err (!%p1813_p8)
}
  0x2d   : > { %1694 = dma.hbm_to_vmem [thread:$0]  (!%p2143_p11), %s2485_s3, 64, %s351_s13, [#allocation6]  }
  0x2e   : > { %s1817_s30 = scalar_lea.hbm %s2486_s4, 16 }
  0x2f   : > { %p1818_p9 = scmp.ne.s32.totalorder %s2486_s4, %s1817_s30  ;;  %p1824_p1 = scmp.lt.u32.totalorder %s1817_s30, %s2486_s4 }
  0x31   : > { %p1820_p12 = pnand %p1818_p9, %p2159_p13 }
  0x33   : > { %p1821_p2 = pneg %p1820_p12 }
  0x35   : > { %p1826_p4 = pnand %p1824_p1, %p1821_p2 }
  0x37   : > { %1829 = shalt.err (!%p1826_p4)
}
  0x38   : > { %s1830_s13 = scalar_lea.vmem %s2147_s15, 16  ;;  %s1837_s12 = scalar_lea.vmem %s2147_s15, 32 }
  0x39   : > { %p1831_p6 = scmp.ne.s32.totalorder %s2147_s15, %s1830_s13  ;;  %p1838_p3 = scmp.lt.s32.totalorder %s2147_s15, %s2147_s15 }
  0x3a   : > { %p1839_p5 = scmp.lt.s32.totalorder %s1837_s12, %s1830_s13 }
  0x3b   : > { %p1833_p8 = pnand %p1831_p6, %p2159_p13 }
  0x3c   : > { %p1840_p7 = por %p1839_p5, %p1838_p3 }
  0x3d   : > { %p1834_p0 = pneg %p1833_p8 }
  0x3f   : > { %p1841_p10 = pnand %p1840_p7, %p1834_p0 }
  0x41   : > { %1844 = shalt.err (!%p1841_p10)
}
  0x42   : > { %1697 = dma.hbm_to_vmem [thread:$0]  (!%p2143_p11), %s2486_s4, 16, %s2147_s15, [#allocation6]  }
  0x43   : > { %s1845_s26 = scalar_lea.hbm %s2488_s6, 16 }
  0x44   : > { %p1846_p9 = scmp.ne.s32.totalorder %s2488_s6, %s1845_s26  ;;  %p1852_p1 = scmp.lt.u32.totalorder %s1845_s26, %s2488_s6 }
  0x46   : > { %p1848_p12 = pnand %p1846_p9, %p2159_p13 }
  0x48   : > { %p1849_p2 = pneg %p1848_p12 }
  0x4a   : > { %p1854_p4 = pnand %p1852_p1, %p1849_p2 }
  0x4c   : > { %1857 = shalt.err (!%p1854_p4)
}
  0x4d   : > { %s1858_s15 = scalar_lea.vmem %s2149_s18, 16  ;;  %s1865_s12 = scalar_lea.vmem %s2149_s18, 32 }
  0x4e   : > { %p1859_p6 = scmp.ne.s32.totalorder %s2149_s18, %s1858_s15  ;;  %p1866_p3 = scmp.lt.s32.totalorder %s2149_s18, %s2149_s18 }
  0x4f   : > { %p1867_p5 = scmp.lt.s32.totalorder %s1865_s12, %s1858_s15 }
  0x50   : > { %p1861_p8 = pnand %p1859_p6, %p2159_p13 }
  0x51   : > { %p1868_p7 = por %p1867_p5, %p1866_p3 }
  0x52   : > { %p1862_p0 = pneg %p1861_p8 }
  0x54   : > { %p1869_p10 = pnand %p1868_p7, %p1862_p0 }
  0x56   : > { %1872 = shalt.err (!%p1869_p10)
}
  0x57   : > { %1700 = dma.hbm_to_vmem [thread:$0]  (!%p2143_p11), %s2488_s6, 16, %s2149_s18, [#allocation9]  }
  0x58   : > { %s2224_s14 = sadd.s32 1, %s2009_s24   ;;  %s93_s20 = sadd.s32 1, %s2005_s23 }
  0x59   : > { %s90_s16 = ssub.s32 %s2009_s24, %s2224_s14  ;;  %p100_p9 = scmp.ne.s32.totalorder %s2005_s23, %s2001_s22 }
  0x5a   : > { %p91_p13 = scmp.eq.s32.totalorder %s90_s16, 0  ;;  %p101_p12 = scmp.eq.s32.totalorder %s2009_s24, 0 }
  0x5b   : > { %p1715_p2 = scmp.lt.s32.totalorder %s2009_s24, 2  ;;  %p2511_p4 = scmp.eq.s32.totalorder %s2115_s25, 1 }
  0x5c   : > { %s2234_s21 = scalar_select %p91_p13, %s2005_s23, %s93_s20  }
  0x5d   : > { %p102_p1 = por %p101_p12, %p100_p9  ;;  %p2238_p6 = por %p2511_p4, %p100_p9 }
  0x5e   : > { %s414_s30 = sand.u32 1, %s2005_s23   ;;  %s1517_s17 = sshll.u32 %s2009_s24, 5 }
  0x5f   : > { %s1516_s18 = sshll.u32 %s414_s30, 1  ;;  %s2247_s15 = scalar_lea.hbm %s2484_s2, %s1517_s17 }
  0x60   : > { %s418_s12 = scalar_lea.vmem [#allocation2], %s1516_s18  ;;  %p2249_p11 = pnand %p1715_p2, %p102_p1 }
  0x61   : > { %s425_s11 = sshll.u32 %s418_s12, 4  ;;  %s415_s16 = scalar_lea.sflag [#allocation3], %s414_s30  ;;  %s2253_s11 = int_to_ptr.vmem [resolvable:$true] %s425_s11 }
  0x62   : > { %s1873_s20 = scalar_lea.hbm %s2247_s15, 32  ;;  %p1875_p0 = pneg %p2249_p11 }
  0x63   : > { %p1874_p8 = scmp.ne.s32.totalorder %s2247_s15, %s1873_s20  ;;  %s1878_s19 = scalar_lea.hbm %s2484_s2, 64 }
  0x64   : > { %p1879_p7 = scmp.lt.u32.totalorder %s2247_s15, %s2484_s2  ;;  %p1880_p10 = scmp.lt.u32.totalorder %s1878_s19, %s1873_s20 }
  0x65   : > { %p1876_p3 = pnand %p1875_p0, %p1874_p8  ;;  %p1882_p9 = scmp.lt.u32.totalorder %s1873_s20, %s2247_s15 }
  0x66   : > { %p1881_p13 = por %p1880_p10, %p1879_p7 }
  0x67   : > { %p1877_p5 = pneg %p1876_p3 }
  0x68   : > { %p1883_p12 = por %p1882_p9, %p1881_p13 }
  0x6a   : > { %p1884_p2 = pnand %p1883_p12, %p1877_p5 }
  0x6c   : > { %1887 = shalt.err (!%p1884_p2)
}
  0x6d   : > { %s1888_s30 = scalar_lea.vmem %s2253_s11, 32  ;;  %s2014_s17 = smov [#allocation2]  }
  0x6e   : > { %p1889_p1 = scmp.ne.s32.totalorder %s2253_s11, %s1888_s30  ;;  %s1893_s18 = sshll.u32 %s2014_s17, 4  ;;  %s1894_s18 = int_to_ptr.vmem [resolvable:$false] %s1893_s18 }
  0x6f   : > { %s1895_s13 = scalar_lea.vmem %s1894_s18, 64  ;;  %p1896_p3 = scmp.lt.s32.totalorder %s2253_s11, %s1894_s18 }
  0x70   : > { %p1891_p4 = pnand %p1889_p1, %p1875_p0  ;;  %p1897_p7 = scmp.lt.s32.totalorder %s1895_s13, %s1888_s30 }
  0x72   : > { %p1892_p8 = pneg %p1891_p4  ;;  %p1898_p10 = por %p1897_p7, %p1896_p3 }
  0x74   : > { %p1899_p13 = pnand %p1898_p10, %p1892_p8 }
  0x76   : > { %1902 = shalt.err (!%p1899_p13)
}
  0x77   : > { %1704 = dma.hbm_to_vmem [thread:$0]  (!%p2249_p11), %s2247_s15, 32, %s2253_s11, %s415_s16  }
  0x78   : > { %p2514_p5 = scmp.ne.s32.totalorder %s2508_s29, 0 }
  0x79   : > { %s2283_s20 = sand.u32 (!%p2514_p5), 1, %s2001_s22   ;;  %p2515_p0 = scmp.ne.s32.totalorder (!%p2514_p5), %s2505_s27, 0 }
  0x7a   : > { %434 = sbr.rel (%p2514_p5) target bundleno = 2432 (0x980), region = 64  ;;  %s1519_s19 = sshll.u32 (!%p2514_p5), %s2283_s20, 1 }
  0x7b   : > { %s437_s12 = scalar_lea.sflag (!%p2514_p5), [#allocation3], %s2283_s20  ;;  %s2287_s30 = scalar_lea.vmem (!%p2514_p5), [#allocation2], %s1519_s19 }
  0x81   : > { %1976 = dma.done.wait (%p2515_p0), %s437_s12, 32  }
  0x82   : > { %1978 = vsyncadd (%p2515_p0), %s437_s12, 4294967264  ;;  %p2516_p11 = scmp.eq.s32.totalorder %s2115_s25, 0 }
  0x84   : > { %1980 = dma.done.wait (%p2516_p11), [#allocation6], 80   ;;  %p2517_p9 = pmov %p2516_p11 }
  0x86   : > { %1982 = vsyncadd (%p2517_p9), [#allocation6], 4294967216  ;;  %p2518_p12 = pmov %p2517_p9 }
  0x87   : > { %p2519_p2 = pmov %p2517_p9 }
  0x88   : > { %1984 = dma.done.wait (%p2518_p12), [#allocation9], 16  }
  0x89   : > { %1986 = vsyncadd (%p2519_p2), [#allocation9], 4294967280  ;;  %p508_p1 = scmp.lt.s32.totalorder %s2115_s25, 1  ;;  %vm546_vm0 = vcmask 1043456   ;;  %vm539_vm1 = vcmask 64512   ;;  %vm618_vm2 = vcmask 261120  }
  0x8a   : > { %v528_v0 = vld [vmem:[#allocation5] sm:$0xf]  ;;  %v1774_v13 = vld [vmem:[%s2487_s5 + $0x8] sm:$0xff]   ;;  %v2015_v58 = vmov 0.0|0.0   ;;  %s1524_s16 = sshll.u32 %s2283_s20, 3  ;;  %vm2016_vm3 = vmmov 0  }
  0x8b   : > { %s509_s29 = scalar_select %p508_p1, %s2115_s25, 1  ;;  %1672 = vmatprep.subr.msk.bf16.mxu0 %vm546_vm0, %v528_v0  ;;  %v548_v1 = vsel %vm546_vm0, %v528_v0, 0  ;;  %v1773_v12 = vld [vmem:[%s2487_s5] sm:$0xff]   ;;  %v1533_v14 = vld [vmem:[#allocation7] ss:$0 sm:$0xff]  ;;  %v2017_v59 = vmov 0.0  }
  0x8c   : > { %1605 = vmatpush3.bf16.msra.mxu0 %v548_v1  ;;  %v1775_v35 = vld [vmem:[%s2489_s7] sm:$0xff]   ;;  %v1776_v36 = vld [vmem:[%s2489_s7 + $0x8] sm:$0xff]   ;;  %s2340_s17 = scalar_lea.vmem [#allocation11], %s1524_s16  ;;  %s1523_s19 = sshll.u32 %s2283_s20, 4  ;;  %vm964_vm4 = vcmask 257024   ;;  %vm1198_vm5 = vcmask 254976  }
  0x8d   : > { %s1566_s15 = sshll.u32 %s509_s29, 4  ;;  %1618 = vmatprep.subr.bf16.mxu0 %v1773_v12  ;;  %v1542_v37 = vld [vmem:[#allocation8] ss:$0 sm:$0xff]  ;;  %1197 = vst [vmem:[%s2340_s17] sm:$0xff] %v2017_v59  ;;  %v1549_v60 = vld [vmem:[%s2490_s8] ss:$0 sm:$0xff]  ;;  %s2347_s12 = scalar_lea.vmem [#allocation10], %s1523_s19 }
  0x8e   : > { %s512_s28 = scalar_lea.vmem %s2482_s0, %s1566_s15  ;;  %s517_s18 = scalar_lea.vmem %s2483_s1, %s1566_s15  ;;  %vm1111_vm6 = vcmask 1041409   ;;  %vm1185_vm7 = vcmask 9216  }
  0x8f   : > { %v1769_v2 = vld [vmem:[%s512_s28] sm:$0xff]   ;;  %v1770_v3 = vld [vmem:[%s512_s28 + $0x8] sm:$0xff]   ;;  %s1338_s11 = sshll.u32 %s2347_s12, 4  ;;  %s1572_s28 = sshll.u32 %s2115_s25, 8  ;;  %s2394_s11 = int_to_ptr.vmem [resolvable:$true] %s1338_s11 }
  0x90   : > { %1606 = vmatprep.mubr.msk.bf16.mxu0 %vm539_vm1, %v1769_v2  ;;  %v1771_v4 = vld [vmem:[%s517_s18] sm:$0xff]   ;;  %v2312_v11 = vld [vmem:[%s517_s18 + $0x8] sm:$0xff]   ;;  %s2520_s13 = sld [smem:[#allocation20_spill]]  ;;  %s1903_s29 = scalar_lea.vmem %s2394_s11, 256 }
  0x91   : > { %1607 = vmatmul.mubr.msk.bf16.vlgmr.msra.gmra.mrb[0].mxu0 %vm539_vm1, %v1770_v3  ;;  %1614 = vmatprep.mubr.msk.bf16.mxu1 %vm618_vm2, %v1771_v4  ;;  %p1904_p4 = scmp.ne.s32.totalorder %s2394_s11, %s1903_s29  ;;  %s2025_s15 = smov [#allocation10]  }
  0x92   : > { %1619 = vmatpush3.bf16.msra.mxu0 %v1773_v12  ;;  %s1907_s27 = sshll.u32 %s2025_s15, 4  ;;  %s1908_s27 = int_to_ptr.vmem [resolvable:$false] %s1907_s27 }
  0x93   : > { %1620 = vmatprep.subr.bf16.mxu0 %v1774_v13  ;;  %p1905_p8 = pnand %p1904_p4, %p2238_p6  ;;  %p1910_p7 = scmp.lt.s32.totalorder %s2394_s11, %s1908_s27 }
  0x95   : > { %p1906_p3 = pneg %p1905_p8 }
  0x96   : > { %1621 = vmatpush3.bf16.msra.mxu0 %v1774_v13  ;;  %s2400_s19 = scalar_lea.hbm %s2520_s13, %s1572_s28 }
  0x97   : > { %1634 = vmatprep.subr.bf16.mxu0 %v1775_v35 }
 0x164   : > { %v1608_v5 = vpop.f32.mrb[0].mxu0 }
 0x165   : > { %v584_v6 = vpop.f32.mrb[1].mxu0 }
 0x166   : > { %v1609_v7 = vpop.f32.mrb[2].mxu0 }
 0x167   : > { %v600_v8 = vpack.c.bf16 %v1609_v7, %v1608_v5  ;;  %v587_v9 = vpop.f32.mrb[3].mxu0 }
 0x168   : > { %v599_v10 = vpack.c.bf16 %v587_v9, %v584_v6 }
 0x16a   : > { %1610 = vmatprep.subr.bf16.mxu1 %v599_v10 }
 0x16b   : > { %1611 = vmatpush3.bf16.msra.mxu1 %v599_v10 }
 0x16c   : > { %1612 = vmatprep.subr.bf16.mxu1 %v600_v8 }
 0x16f   : > { %1613 = vmatpush3.bf16.msra.mxu1 %v600_v8 }
 0x172   : > { %1615 = vmatmul.mubr.msk.bf16.vlgmr.msra.gmra.mrb[0].mxu1 %vm618_vm2, %v2312_v11 }
 0x173   : > { %1630 = vmatprep.mubr.msk.bf16.mxu1 %vm618_vm2, %v1771_v4 }
 0x245   : > { %v1616_v15 = vpop.f32.mrb[0].mxu1 }
 0x246   : > { %v668_v16 = vadd.f32 %v1616_v15, %v1533_v14  ;;  %v659_v17 = vpop.f32.mrb[1].mxu1  ;;  %v527_v15 = vld [vmem:[%s2287_s30] sm:$0x3] }
 0x247   : > { %v660_v18 = vadd.f32 %v1533_v14, %v659_v17  ;;  %v1617_v19 = vpop.f32.mrb[2].mxu1 }
 0x248   : > { %v671_v20 = vadd.f32 %v1617_v19, %v1533_v14  ;;  %v662_v21 = vpop.f32.mrb[3].mxu1  ;;  %v676_v23 = vmax.f32 %v668_v16, 0.0  ;;  %v2018_v16 = vmov 1966171168  }
 0x249   : > { %v663_v22 = vadd.f32 %v1533_v14, %v662_v21  ;;  %v674_v25 = vmax.f32 %v660_v18, 0.0  ;;  %v1045_v17 = vunpack.c.l.s4 %v2018_v16  ;;  %v1047_v18 = vlaneseq }
 0x24a   : > { %v677_v24 = vmax.f32 %v671_v20, 0.0 }
 0x24b   : > { %v675_v26 = vmax.f32 %v663_v22, 0.0  ;;  %v1046_v19 = vunpack.c.0.s8 %v1045_v17  ;;  %v2357_v20 = vshrl.u32 %v1047_v18, 7 }
 0x24c   : > { %v679_v27 = vpack.c.bf16 %v677_v24, %v676_v23 }
 0x24d   : > { %v678_v28 = vpack.c.bf16 %v675_v26, %v674_v25  ;;  %v1049_v21 = vsub.s32 %v1046_v19, %v2357_v20  ;;  %v1068_v25 = vsub.s32 0, %v2357_v20 }
 0x24f   : > { %1622 = vmatprep.mubr.msk.bf16.mxu0 %vm618_vm2, %v678_v28  ;;  %v1042_v28 = vld [vmem:[%s2491_s9] sm:$0xff] }
 0x250   : > { %1623 = vmatmul.mubr.msk.bf16.vlgmr.msra.gmra.mrb[4].mxu0 %vm618_vm2, %v679_v27 }
 0x251   : > { %1635 = vmatpush3.bf16.msra.mxu0 %v1775_v35 }
 0x252   : > { %1636 = vmatprep.subr.bf16.mxu0 %v1776_v36 }
 0x255   : > { %1637 = vmatpush3.bf16.msra.mxu0 %v1776_v36 }
 0x256   : > { %1666 = vmatprep.subr.bf16.mxu0 %v2015_v58 }
 0x323   : > { %v1624_v29 = vpop.f32.mrb[4].mxu0 }
 0x324   : > { %v736_v30 = vpop.f32.mrb[5].mxu0 }
 0x325   : > { %v1625_v31 = vpop.f32.mrb[6].mxu0 }
 0x326   : > { %v752_v32 = vpack.c.bf16 %v1625_v31, %v1624_v29  ;;  %v739_v33 = vpop.f32.mrb[7].mxu0 }
 0x327   : > { %v751_v34 = vpack.c.bf16 %v739_v33, %v736_v30 }
 0x329   : > { %1626 = vmatprep.subr.bf16.mxu1 %v751_v34 }
 0x32a   : > { %1627 = vmatpush3.bf16.msra.mxu1 %v751_v34 }
 0x32b   : > { %1628 = vmatprep.subr.bf16.mxu1 %v752_v32 }
 0x32e   : > { %1629 = vmatpush3.bf16.msra.mxu1 %v752_v32 }
 0x331   : > { %1631 = vmatmul.mubr.msk.bf16.vlgmr.msra.gmra.mrb[4].mxu1 %vm618_vm2, %v2312_v11 }
 0x332   : > { %1646 = vmatprep.mubr.msk.bf16.mxu1 %vm618_vm2, %v1771_v4 }
 0x404   : > { %v1632_v38 = vpop.f32.mrb[4].mxu1 }
 0x405   : > { %v803_v39 = vadd.f32 %v1632_v38, %v1542_v37  ;;  %v794_v40 = vpop.f32.mrb[5].mxu1  ;;  %v2019_v38 = vmov 0  }
 0x406   : > { %v795_v41 = vadd.f32 %v1542_v37, %v794_v40  ;;  %v1633_v42 = vpop.f32.mrb[6].mxu1  ;;  %1767 = vset.pattern.permute.xlu0 %v2019_v38  ;;  %1768 = vset.pattern.permute.xlu1 %v2019_v38  ;;  %v2020_v40 = vmov 269488144  }
 0x407   : > { %v806_v43 = vadd.f32 %v1633_v42, %v1542_v37  ;;  %v797_v44 = vpop.f32.mrb[7].mxu1  ;;  %v811_v46 = vmax.f32 %v803_v39, 0.0  ;;  %v1098_v39 = vld [vmem:[%s2492_s10] sm:$0xff]  ;;  %v2021_v42 = vmov 842150450  }
 0x408   : > { %v798_v45 = vadd.f32 %v1542_v37, %v797_v44  ;;  %v809_v48 = vmax.f32 %v795_v41, 0.0  ;;  %v1203_v41 = vunpack.c.l.s4 %v2020_v40  ;;  %v2022_v44 = vmov 1414812756  }
 0x409   : > { %v812_v47 = vmax.f32 %v806_v43, 0.0  ;;  %v1210_v43 = vunpack.c.l.s4 %v2021_v42 }
 0x40a   : > { %v810_v49 = vmax.f32 %v798_v45, 0.0  ;;  %v1217_v45 = vunpack.c.l.s4 %v2022_v44 }
 0x40b   : > { %v814_v50 = vpack.c.bf16 %v812_v47, %v811_v46  ;;  %v2023_v46 = vmov 1987475062  }
 0x40c   : > { %v813_v51 = vpack.c.bf16 %v810_v49, %v809_v48  ;;  %v1224_v47 = vunpack.c.l.s4 %v2023_v46  ;;  %v1204_v48 = vunpack.c.0.s8 %v1203_v41  ;;  %v1211_v49 = vunpack.c.0.s8 %v1210_v43 }
 0x40e   : > { %1638 = vmatprep.mubr.msk.bf16.mxu0 %vm618_vm2, %v813_v51 }
 0x40f   : > { %1639 = vmatmul.mubr.msk.bf16.vlgmr.msra.gmra.mrb[8].mxu0 %vm618_vm2, %v814_v50  ;;  %v2024_v50 = vmov 1983009808  }
 0x410   : > { %1658 = vmatprep.mubr.msk.f32.mxu0 %vm2016_vm3, %v2017_v59  ;;  %v1261_v51 = vunpack.c.l.s4 %v2024_v50 }
 0x4e2   : > { %v1640_v52 = vpop.f32.mrb[8].mxu0 }
 0x4e3   : > { %v871_v53 = vpop.f32.mrb[9].mxu0 }
 0x4e4   : > { %v1641_v54 = vpop.f32.mrb[10].mxu0 }
 0x4e5   : > { %v887_v55 = vpack.c.bf16 %v1641_v54, %v1640_v52  ;;  %v874_v56 = vpop.f32.mrb[11].mxu0  ;;  %v1218_v52 = vunpack.c.0.s8 %v1217_v45  ;;  %v1207_v54 = vsub.s32 %v1204_v48, %v2357_v20 }
 0x4e6   : > { %v886_v57 = vpack.c.bf16 %v874_v56, %v871_v53  ;;  %v1225_v53 = vunpack.c.0.s8 %v1224_v47  ;;  %v1262_v56 = vunpack.c.0.s8 %v1261_v51 }
 0x4e8   : > { %1642 = vmatprep.subr.bf16.mxu1 %v886_v57 }
 0x4e9   : > { %1643 = vmatpush3.bf16.msra.mxu1 %v886_v57  ;;  %v1221_v57 = vsub.s32 %v1218_v52, %v2357_v20 }
 0x4ea   : > { %1644 = vmatprep.subr.bf16.mxu1 %v887_v55 }
 0x4ed   : > { %1645 = vmatpush3.bf16.msra.mxu1 %v887_v55  ;;  %v1214_v55 = vsub.s32 %v1211_v49, %v2357_v20 }
 0x4f0   : > { %1647 = vmatmul.mubr.msk.bf16.vlgmr.msra.gmra.mrb[8].mxu1 %vm618_vm2, %v2312_v11 }
 0x5c3   : > { %v1648_v61 = vpop.f32.mrb[8].mxu1 }
 0x5c4   : > { %v938_v62 = vadd.f32 %v1648_v61, %v1549_v60  ;;  %v929_v63 = vpop.f32.mrb[9].mxu1 }
 0x5c5   : > { %v930_v0 = vadd.f32 %v1549_v60, %v929_v63  ;;  %v1649_v1 = vpop.f32.mrb[10].mxu1  ;;  %v2375_v63 = vsub.s32 %v1262_v56, %v2357_v20 }
 0x5c6   : > { %v946_v2 = vmax.f32 %v938_v62, 0.0  ;;  %v941_v3 = vadd.f32 %v1649_v1, %v1549_v60  ;;  %v932_v4 = vpop.f32.mrb[11].mxu1 }
 0x5c7   : > { %v944_v5 = vmax.f32 %v930_v0, 0.0  ;;  %v933_v6 = vadd.f32 %v1549_v60, %v932_v4 }
 0x5c8   : > { %v1570_v7 = vpack.c.bf16 %v946_v2, %v946_v2  ;;  %v947_v8 = vmax.f32 %v941_v3, 0.0 }
 0x5c9   : > { %v1568_v9 = vpack.c.bf16 %v944_v5, %v944_v5  ;;  %v945_v10 = vmax.f32 %v933_v6, 0.0 }
 0x5ca   : > { %967 = vst.msk [vmem:[%s2347_s12 + $0x8] sm:$0xf] %vm964_vm4, %v1570_v7  ;;  %v1571_v11 = vpack.c.bf16 %v947_v8, %v947_v8  ;;  %v1670_v12 = vpack.c.bf16 %v947_v8, %v946_v2 }
 0x5cb   : > { %965 = vst.msk [vmem:[%s2347_s12] sm:$0xf] %vm964_vm4, %v1568_v9  ;;  %v1569_v13 = vpack.c.bf16 %v945_v10, %v945_v10  ;;  %v1667_v14 = vpack.c.bf16 %v945_v10, %v944_v5 }
 0x5cc   : > { %968 = vst.msk [vmem:[%s2347_s12 + $0xc] sm:$0xf] %vm964_vm4, %v1571_v11 }
 0x5cd   : > { %966 = vst.msk [vmem:[%s2347_s12 + $0x4] sm:$0xf] %vm964_vm4, %v1569_v13  ;;  %1668 = vmatpush3.bf16.msra.mxu0 %v1667_v14  ;;  %s1909_s12 = scalar_lea.vmem %s1908_s27, 512 }
 0x5ce   : > { %1669 = vmatprep.subr.bf16.mxu0 %v2015_v58  ;;  %v1228_v58 = vsub.s32 %v1225_v53, %v2357_v20  ;;  %p1911_p10 = scmp.lt.s32.totalorder %s1909_s12, %s1903_s29 }
 0x5d0   : > { %p1912_p13 = por %p1911_p10, %p1910_p7 }
 0x5d1   : > { %1671 = vmatpush3.bf16.msra.mxu0 %v1670_v12 }
 0x5d2   : > { %1661 = vmatprep.subr.mxu0 %v2017_v59  ;;  %p1913_p5 = pnand %p1912_p13, %p1906_p3 }
 0x5d4   : > { %1659 = vmatmul.mubr.msk.f32.vlgmr.msra.gmra.mrb[12].mxu0 %vm618_vm2, %v527_v15 }
 0x5d5   : > { %1663 = vmatprep.mubr.msk.f32.mxu0 %vm2016_vm3, %v2017_v59  ;;  %1662 = vmatpush3.msra.mxu0 %v1098_v39 }
 0x6a7   : > { %v1038_v22 = vpop.f32.mrb[12].mxu0 }
 0x6a8   : > { %v1050_v23 = vrot.slane %v1038_v22, %v1049_v21  ;;  %1199 = vst.msk [vmem:[%s2340_s17] sm:$0x3] %vm1198_vm5, %v1038_v22  ;;  %v1660_v24 = vpop.f32.mrb[13].mxu0 }
 0x6aa   : > { %v1051_v26 = vcombine.high %v1050_v23, %v1050_v23  ;;  %v1058_v27 = vrot.slane %v1050_v23, %v1049_v21 }
 0x6ac   : > { %v1065_v29 = vrot.slane %v1051_v26, %v1049_v21  ;;  %v1069_v30 = vrot.slane %v1058_v27, %v1068_v25  ;;  %v1102_v26 = vand.u32 127, %v1047_v18 }
 0x6ae   : > { %v1076_v31 = vsub.f32 %v1069_v30, %v1042_v28  ;;  %v1073_v32 = vrot.slane %v1065_v29, %v1068_v25  ;;  %v2383_v29 = vsub.s32 %v1102_v26, %v2357_v20 }
 0x6b0   : > { %v1078_v33 = vmul.f32 %v1076_v31, %v1076_v31  ;;  %v1077_v34 = vsub.f32 %v1073_v32, %v1042_v28 }
 0x6b2   : > { %v1080_v35 = vsel %vm618_vm2, %v1078_v33, 0.0  ;;  %v1079_v36 = vmul.f32 %v1077_v34, %v1077_v34 }
 0x6b3   : > { %1081 = vadd.xlane.f32.xlu0 %v1080_v35 }
 0x6b4   : > { %v1083_v37 = vsel %vm618_vm2, %v1079_v36, 0.0 }
 0x6b7   : > { %1084 = vadd.xlane.f32.xlu0 %v1083_v37 }
 0x740   : > { %v1082_v59 = vpop.xlane.xlu0 %1081 }
 0x741   : > { %v1088_v60 = vadd.f32 0.0001, %v1082_v59  ;;  %v1208_v61 = vrot.slane %v1082_v59, %v1207_v54  ;;  %v1215_v62 = vrot.slane %v1082_v59, %v1214_v55  ;;  %v1222_v0 = vrot.slane %v1082_v59, %v1221_v57 }
 0x742   : > { %v1229_v1 = vrot.slane %v1082_v59, %v1228_v58  ;;  %v1086_v17 = vadd.f32 1.0, %v1082_v59 }
 0x743   : > { %1777 = vrcp.f32 %v1088_v60  ;;  %v1258_v2 = vcombine.low %v1208_v61, %v1215_v62 }
 0x744   : > { %v1085_v3 = vpop.xlane.xlu0 %1084  ;;  %v1259_v4 = vcombine.low %v1222_v0, %v1229_v1 }
 0x745   : > { %v1089_v5 = vadd.f32 0.0001, %v1085_v3  ;;  %v1266_v6 = vrot.slane %v1258_v2, %v2375_v63  ;;  %v1236_v7 = vrot.slane %v1085_v3, %v1207_v54  ;;  %v1243_v9 = vrot.slane %v1085_v3, %v1214_v55 }
 0x746   : > { %v1273_v8 = vrot.slane %v1259_v4, %v2375_v63  ;;  %v1250_v10 = vrot.slane %v1085_v3, %v1221_v57  ;;  %v1257_v11 = vrot.slane %v1085_v3, %v1228_v58  ;;  %v1087_v23 = vadd.f32 1.0, %v1085_v3 }
 0x747   : > { %1779 = vrcp.f32 %v1089_v5  ;;  %v1275_v13 = vcombine.low %v1236_v7, %v1243_v9 }
 0x748   : > { %v1274_v12 = vcombine.low %v1266_v6, %v1273_v8  ;;  %v1276_v14 = vcombine.low %v1250_v10, %v1257_v11 }
 0x749   : > { %v1283_v15 = vrot.slane %v1275_v13, %v2375_v63 }
 0x74a   : > { %1293 = vperm.xlu0 %1767, %v1274_v12   ;;  %v1290_v16 = vrot.slane %v1276_v14, %v2375_v63 }
 0x74c   : > { %v1291_v19 = vcombine.low %v1283_v15, %v1290_v16 }
 0x74d   : > { %v1778_v21 = vpop.eup %1777 }
 0x74e   : > { %v1091_v22 = vmul.f32 %v1778_v21, %v1086_v17 }
 0x750   : > { %1781 = vlog2.f32 %v1091_v22 }
 0x751   : > { %v1780_v24 = vpop.eup %1779 }
 0x752   : > { %v1093_v25 = vmul.f32 %v1780_v24, %v1087_v23 }
 0x754   : > { %1783 = vlog2.f32 %v1093_v25 }
 0x75a   : > { %v1782_v27 = vpop.eup %1781 }
 0x75b   : > { %v1095_v28 = vmul.f32 0.6931472, %v1782_v27 }
 0x75d   : > { %v1106_v32 = vrot.slane %v1095_v28, %v2383_v29 }
 0x75e   : > { %v1784_v30 = vpop.eup %1783 }
 0x75f   : > { %v1097_v31 = vmul.f32 0.6931472, %v1784_v30 }
 0x761   : > { %v1110_v33 = vrot.slane %v1097_v31, %v2383_v29 }
 0x763   : > { %v1112_v34 = vsel %vm1111_vm6, %v1110_v33, %v1106_v32 }
 0x764   : > { %1664 = vmatmul.mubr.msk.f32.vlgmr.msra.gmra.mrb[14].mxu0 %vm539_vm1, %v1112_v34 }
 0x837   : > { %v1181_v18 = vpop.f32.mrb[14].mxu0 }
 0x838   : > { %v1665_v35 = vpop.f32.mrb[15].mxu0  ;;  %v1186_v20 = vsel %vm1185_vm7, %v1181_v18, -inf  ;;  %1317 = vst.msk [vmem:[%s2340_s17 + $0x4] sm:$0x3] %vm1185_vm7, %v1181_v18 }
 0x839   : > { %1187 = vmax.xlane.f32.xlu1 %v1186_v20 }
 0x8c6   : > { %v1188_v36 = vpop.xlane.xlu1 %1187 }
 0x8c7   : > { %v1189_v37 = vsub.f32 %v1181_v18, %v1188_v36 }
 0x8c9   : > { %v1190_v38 = vmul.f32 1.442695, %v1189_v37 }
 0x8cb   : > { %1785 = vpow2.f32 %v1190_v38 }
 0x8d5   : > { %v1786_v39 = vpop.eup %1785 }
 0x8d6   : > { %v1192_v40 = vsel %vm1185_vm7, %v1786_v39, 0.0 }
 0x8d7   : > { %1193 = vadd.xlane.f32.xlu1 %v1192_v40 }
 0x8e8   : > { %1296 = vperm.xlu1 %1768, %v1291_v19  }
 0x8e9   : > { %1916 = shalt.err (!%p1913_p5)
}
 0x8ea   : > { %s1917_s28 = scalar_lea.hbm %s2400_s19, 256  ;;  %s1921_s15 = scalar_lea.hbm %s2520_s13, 512 }
 0x8eb   : > { %p1918_p0 = scmp.ne.s32.totalorder %s2400_s19, %s1917_s28  ;;  %p1922_p12 = scmp.lt.u32.totalorder %s2400_s19, %s2520_s13 }
 0x8ec   : > { %p1923_p2 = scmp.lt.u32.totalorder %s1921_s15, %s1917_s28  ;;  %p1925_p4 = scmp.lt.u32.totalorder %s1917_s28, %s2400_s19 }
 0x8ed   : > { %p1919_p11 = pnand %p1918_p0, %p2238_p6 }
 0x8ee   : > { %p1924_p1 = por %p1923_p2, %p1922_p12 }
 0x8ef   : > { %p1920_p9 = pneg %p1919_p11 }
 0x8f0   : > { %p1926_p8 = por %p1925_p4, %p1924_p1 }
 0x8f2   : > { %p1927_p3 = pnand %p1926_p8, %p1920_p9 }
 0x8f4   : > { %1930 = shalt.err (!%p1927_p3)
}
 0x8f5   : > { %s2026_s29 = smov 64   ;;  %s2027_s12 = smov 4   ;;  %v1294_v42 = vpop.permute.xlu0 %1293  ;;  %vm1315_vm8 = vcmask 58368  }
 0x8f6   : > { %s2521_s16 = scalar_lea.sflag [#allocation4], %s2283_s20  ;;  %v1301_v44 = vrot.slane %v1294_v42, %v2383_v29  ;;  %s1573_s30 = sshll.u32 %s2115_s25, 7 }
 0x8f7   : > { %1687 = dma.vmem_to_hbm [thread:$0]  (%p2238_p6), %s2394_s11, 256, %s2400_s19, %s2521_s16, %s2026_s29, %s2026_s29, %s2027_s12  }
 0x8f8   : > { %s1355_s28 = sshll.u32 %s2340_s17, 4  ;;  %s2522_s18 = sld [smem:[#allocation21_spill]]  ;;  %s2438_s28 = int_to_ptr.vmem [resolvable:$true] %s1355_s28 }
 0x8f9   : > { %s1325_s27 = scalar_lea.sflag [#allocation12], %s2283_s20  ;;  %s1931_s29 = scalar_lea.vmem %s2438_s28, 128 }
 0x8fa   : > { %p1932_p7 = scmp.ne.s32.totalorder %s2438_s28, %s1931_s29  ;;  %s2028_s25 = smov [#allocation11]  }
 0x8fb   : > { %s1935_s12 = sshll.u32 %s2028_s25, 4  ;;  %s1936_s12 = int_to_ptr.vmem [resolvable:$false] %s1935_s12 }
 0x8fc   : > { %p1933_p10 = pnand %p1932_p7, %p2238_p6  ;;  %s1937_s16 = scalar_lea.vmem %s1936_s12, 256 }
 0x8fd   : > { %p1938_p5 = scmp.lt.s32.totalorder %s2438_s28, %s1936_s12  ;;  %p1939_p0 = scmp.lt.s32.totalorder %s1937_s16, %s1931_s29 }
 0x8fe   : > { %s2436_s15 = scalar_lea.hbm %s2522_s18, %s1573_s30  ;;  %p1934_p13 = pneg %p1933_p10 }
 0x8ff   : > { %p1940_p11 = por %p1939_p0, %p1938_p5 }
 0x901   : > { %p1941_p9 = pnand %p1940_p11, %p1934_p13 }
 0x964   : > { %v1194_v41 = vpop.xlane.xlu1 %1193 }
 0x965   : > { %1787 = vrcp.f32 %v1194_v41 }
 0x968   : > { %v1297_v43 = vpop.permute.xlu1 %1296 }
 0x969   : > { %v1305_v45 = vrot.slane %v1297_v43, %v2383_v29 }
 0x96b   : > { %v1306_v46 = vsel %vm1111_vm6, %v1305_v45, %v1301_v44 }
 0x96c   : > { %v1313_v47 = vrot.slane %v1306_v46, %v2375_v63 }
 0x96e   : > { %1316 = vst.msk [vmem:[%s2340_s17 + $0x2] sm:$0x3] %vm1315_vm8, %v1313_v47 }
 0x96f   : > { %v1788_v48 = vpop.eup %1787 }
 0x970   : > { %v1196_v49 = vmul.f32 %v1788_v48, %v1786_v39 }
 0x972   : > { %1318 = vst.msk [vmem:[%s2340_s17 + $0x6] sm:$0x3] %vm1185_vm7, %v1196_v49 }
 0x973   : > { %1944 = shalt.err (!%p1941_p9)
}
 0x974   : > { %s1945_s20 = scalar_lea.hbm %s2436_s15, 128  ;;  %s1949_s11 = scalar_lea.hbm %s2522_s18, 256 }
 0x975   : > { %p1946_p12 = scmp.ne.s32.totalorder %s2436_s15, %s1945_s20  ;;  %p1950_p4 = scmp.lt.u32.totalorder %s2436_s15, %s2522_s18 }
 0x976   : > { %p1951_p8 = scmp.lt.u32.totalorder %s1949_s11, %s1945_s20  ;;  %p1953_p7 = scmp.lt.u32.totalorder %s1945_s20, %s2436_s15 }
 0x977   : > { %p1947_p2 = pnand %p1946_p12, %p2238_p6 }
 0x978   : > { %p1952_p3 = por %p1951_p8, %p1950_p4 }
 0x979   : > { %p1948_p1 = pneg %p1947_p2 }
 0x97a   : > { %p1954_p10 = por %p1953_p7, %p1952_p3 }
 0x97c   : > { %p1955_p13 = pnand %p1954_p10, %p1948_p1 }
 0x97e   : > { %1958 = shalt.err (!%p1955_p13)
}
 0x97f   : > { %1688 = dma.vmem_to_hbm [thread:$0]  (%p2238_p6), %s2438_s28, 128, %s2436_s15, %s1325_s27  }
 0x980 PF: > { %s2523_s29 = sld [smem:[#allocation18_spill]]  ;;  %s2524_s12 = sld [smem:[#allocation19_spill]] }
 0x981   : > { %p2526_p0 = scmp.ge.s32.totalorder %s2009_s24, 2 }
 0x986   : > { %s1367_s16 = sand.u32 1, %s2523_s29   ;;  %p2525_p5 = scmp.ne.s32.totalorder %s2524_s12, 0 }
 0x987   : > { %s1368_s17 = scalar_lea.sflag [#allocation4], %s1367_s16 }
 0x988   : > { %p1706_p11 = pnand %p2526_p0, %p2525_p5 }
 0x98a   : > { %1988 = dma.done.wait (!%p1706_p11), %s1368_s17, 256  }
 0x98b   : > { %1990 = vsyncadd (!%p1706_p11), %s1368_s17, 4294967040  ;;  %s1377_s20 = scalar_lea.sflag [#allocation12], %s1367_s16 }
 0x98c   : > { %1992 = dma.done.wait (!%p1706_p11), %s1377_s20, 128  }
 0x98d   : > { %1994 = vsyncadd (!%p1706_p11), %s1377_s20, 4294967168  ;;  %s2527_s26 = smov %s2234_s21  ;;  %p31_p6 = scmp.ge.s32.totalorder %s2224_s14, 4  }
 0x98e   : > { %s2528_s21 = smov %s2001_s22  ;;  %s2529_s22 = smov %s2005_s23 }
 0x98f   : > { %s2530_s23 = smov %s2527_s26  ;;  %s2531_s24 = smov %s2224_s14 }
 0x990   :  { %33 = sbr.rel (!%p31_p6) target bundleno = 12 (0xc), region = 144 }
 0x997   :  { %1382 = vsyncpa [#allocation3], 1 }
 0x998   :  { %1384 = vsyncpa [#allocation3 + $0x1], 1 }
 0x999   :  { %1385 = vsyncpa [#allocation6], 1 }
 0x99a   :  { %1386 = vsyncpa [#allocation9], 1 }
 0x99b   :  { %1387 = vsyncpa [#allocation4], 1 }
 0x99c   :  { %1389 = vsyncpa [#allocation4 + $0x1], 1 }
 0x99d   :  { %1390 = vsyncpa [#allocation12], 1 }
 0x99e   :  { %1392 = vsyncpa [#allocation12 + $0x1], 1 }

</bundles_post_ra>
